<compile_context>
chip_gen: v7x
topology: tpu7x:2x2x1
jax: 0.10.0
libtpu: 0.0.40
codegen_flags: <defaults>
</compile_context>

<pallas_src>
import functools

import jax
import jax.numpy as jnp
from jax import lax
from jax.experimental import pallas as pl
from jax.experimental.pallas import tpu as pltpu

KMEANS_ITERS = 20  # fixed iteration count (deterministic)


# ---------------------------------------------------------------------------
# Kernel 1: fused projection + global k-means
#   - projects R[b] = qk[b] @ W_R[b] into a VMEM scratch (no HBM round trip)
#   - runs Lloyd's k-means over all B*S projected tokens
#   - outputs compact int32 cluster indices of shape (B*S, 1)
# ---------------------------------------------------------------------------
def _route_kernel(qk_ref, wr_ref, cid_ref, x_scratch, *, num_clusters, iters):
    B, S, D = qk_ref.shape
    N = B * S
    K = num_clusters

    # --- fused per-batch projection: X[b*S:(b+1)*S] = qk[b] @ W_R[b] (bf16 MXU, f32 acc)
    for b in range(B):  # static unroll; one MXU matmul per batch
        qb = qk_ref[b].astype(jnp.bfloat16)          # (S, D)
        wb = wr_ref[b].astype(jnp.bfloat16)          # (D, D)
        x_scratch[b * S:(b + 1) * S, :] = jnp.dot(
            qb, wb, preferred_element_type=jnp.float32)

    X = x_scratch[...]                               # (N, D) f32
    Xb = X.astype(jnp.bfloat16)                      # bf16 copy for MXU feeds
    x_sq = jnp.sum(X * X, axis=-1, keepdims=True)    # (N, 1) f32
    ones_1d = jnp.ones((1, D), jnp.float32)
    iota_k = lax.broadcasted_iota(jnp.int32, (N, K), 1)
    # ones column folded into X so one matmul per iteration yields sums + counts
    X_aug = jnp.concatenate(
        [X, jnp.ones((N, 1), jnp.float32)], axis=-1).astype(jnp.bfloat16)  # (N, D+1)

    def assign(C):
        # squared euclidean distance, K kept on the lane axis (no transposes).
        Cb = C.astype(jnp.bfloat16)
        dots = lax.dot_general(Xb, Cb, (((1,), (1,)), ((), ())),
                               preferred_element_type=jnp.float32)      # (N, K)
        c_sq = lax.dot_general(ones_1d, C * C, (((1,), (1,)), ((), ())),
                               preferred_element_type=jnp.float32)      # (1, K)
        d = x_sq - 2.0 * dots + c_sq                                    # (N, K) f32
        d_min = jnp.min(d, axis=-1, keepdims=True)                      # (N, 1)
        return jnp.min(jnp.where(d <= d_min, iota_k, K),
                       axis=-1, keepdims=True)                          # (N, 1) argmin

    def body(_, C):
        idx = assign(C)
        oh = (iota_k == idx).astype(jnp.bfloat16)                       # (N, K)
        sums_aug = lax.dot_general(oh, X_aug, (((0,), (0,)), ((), ())),
                                   preferred_element_type=jnp.float32)  # (K, D+1)
        counts = sums_aug[:, D:D + 1]                                   # (K, 1)
        new_c = sums_aug[:, 0:D] / jnp.maximum(counts, 1.0)             # f32 divide
        return jnp.where(counts > 0.0, new_c, C)                        # keep empty clusters

    # TODO(synk): kmeans_pytorch uses random initial centroids and a convergence
    # tolerance; here init = first K projected points and a fixed iteration count.
    # TODO(synk): for production B*S, tile the assign/update passes over N
    # (grid + partial-sum reduction) to stay within v7x VMEM and use both TCs.
    C0 = X[0:K, :]
    C = lax.fori_loop(0, iters, body, C0)
    cid_ref[...] = assign(C)


# ---------------------------------------------------------------------------
# Kernel 2: same-cluster attention mask, one (TS, TS) tile per grid step.
# Pure VPU compare of broadcast row ids vs. column ids (no MXU, no K axis).
# ---------------------------------------------------------------------------
def _mask_kernel(row_ref, col_ref, out_ref):
    eq = row_ref[0] == col_ref[0]                    # (TS,1) vs (1,TS) -> (TS,TS)
    out_ref[0] = jnp.where(eq, 0.0, -10000.0).astype(jnp.float32)


def _mask_tile(S):
    for ts in (512, 256, 128):
        if S % ts == 0:
            return ts
    return S  # small / irregular S: full-extent block


# ---------------------------------------------------------------------------
# Wrapper
# ---------------------------------------------------------------------------
def routing_attention(qk, w_r, n_heads):
    B, S, D = qk.shape
    K = int(S ** 0.5)
    N = B * S

    # 1) + 2) fused projection + global k-means over all B*S tokens
    cid = pl.pallas_call(
        functools.partial(_route_kernel, num_clusters=K, iters=KMEANS_ITERS),
        out_shape=jax.ShapeDtypeStruct((N, 1), jnp.int32),
        scratch_shapes=[pltpu.VMEM((N, D), jnp.float32)],
    )(qk.astype(jnp.float32), w_r.astype(jnp.float32))

    cid = cid.reshape(B, S)
    cid_row = cid[:, :, None]                        # (B, S, 1)
    cid_col = cid[:, None, :]                        # (B, 1, S)

    # 3) per-batch (S, S) mask, tiled over (S/TS, S/TS); heads broadcast outside.
    ts = _mask_tile(S)
    mask_b = pl.pallas_call(
        _mask_kernel,
        out_shape=jax.ShapeDtypeStruct((B, S, S), jnp.float32),
        grid=(B, S // ts, S // ts),
        in_specs=[pl.BlockSpec((1, ts, 1), lambda b, i, j: (b, i, 0)),
                  pl.BlockSpec((1, 1, ts), lambda b, i, j: (b, 0, j))],
        out_specs=pl.BlockSpec((1, ts, ts), lambda b, i, j: (b, i, j)),
        compiler_params=pltpu.CompilerParams(
            dimension_semantics=("parallel", "parallel", "parallel")),
    )(cid_row, cid_col)

    # mask is identical for every head -> broadcast outside the kernel.
    return jnp.broadcast_to(mask_b[:, None, :, :], (B, n_heads, S, S))


# ---------------------------------------------------------------------------
# Deterministic parameter init (mimics nn.init.orthogonal_ on a (B, D, D) tensor:
# torch flattens to (B, D*D) and makes the rows orthonormal).
# ---------------------------------------------------------------------------
def orthogonal_w_r(key, batch, dim):
    rows, cols = batch, dim * dim
    a = jax.random.normal(key, (rows, cols), jnp.float32)
    flat = a.T if rows < cols else a
    q, r = jnp.linalg.qr(flat)
    d = jnp.sign(jnp.diagonal(r))
    q = q * d[None, :]
    if rows < cols:
        q = q.T
    return q.reshape(batch, dim, dim).astype(jnp.float32)


if __name__ == "__main__":
    B, S, D, H = 2, 16, 32, 4   # seq_len=16 -> K = int(sqrt(16)) = 4 clusters

    key = jax.random.PRNGKey(0)
    k_qk, k_w = jax.random.split(key)
    qk = jax.random.normal(k_qk, (B, S, D), jnp.float32)
    w_r = orthogonal_w_r(k_w, B, D)

    mask = jax.block_until_ready(routing_attention(qk, w_r, n_heads=H))

    assert mask.shape == (B, H, S, S) and mask.dtype == jnp.float32
    # mask values are exactly {0, -10000}
    assert bool(jnp.all((mask == 0.0) | (mask == -10000.0)))
    # each token shares a cluster with itself -> diagonal is 0
    assert bool(jnp.all(jnp.diagonal(mask, axis1=-2, axis2=-1) == 0.0))
    # same-cluster relation is symmetric
    assert bool(jnp.all(mask == jnp.swapaxes(mask, -1, -2)))
    # identical mask replicated across heads
    assert bool(jnp.all(mask == mask[:, :1]))

    print("KERNEL_OK")
</pallas_src>

<mosaic_0001>
module attributes {stable_mosaic.version = 11 : i64} {
  func.func @_route_kernel(%arg0: memref<2x16x32xf32, #tpu.memory_space<vmem>>, %arg1: memref<2x32x32xf32, #tpu.memory_space<vmem>>, %arg2: memref<32x1xi32, #tpu.memory_space<vmem>>, %arg3: memref<32x32xf32, #tpu.memory_space<vmem>>) attributes {dimension_semantics = [], scalar_prefetch = 0 : i64, scratch_operands = 1 : i64, tpu.core_type = #tpu.core_type<tc>} {
    %c0 = arith.constant 0 : index
    %c0_0 = arith.constant 0 : index
    %c0_1 = arith.constant 0 : index
    %0 = vector.load %arg0[%c0, %c0_0, %c0_1] : memref<2x16x32xf32, #tpu.memory_space<vmem>>, vector<1x16x32xf32>
    %1 = vector.shape_cast %0 : vector<1x16x32xf32> to vector<16x32xf32>
    %2 = arith.truncf %1 : vector<16x32xf32> to vector<16x32xbf16>
    %c0_2 = arith.constant 0 : index
    %c0_3 = arith.constant 0 : index
    %c0_4 = arith.constant 0 : index
    %3 = vector.load %arg1[%c0_2, %c0_3, %c0_4] : memref<2x32x32xf32, #tpu.memory_space<vmem>>, vector<1x32x32xf32>
    %4 = vector.shape_cast %3 : vector<1x32x32xf32> to vector<32x32xf32>
    %5 = arith.truncf %4 : vector<32x32xf32> to vector<32x32xbf16>
    %cst = arith.constant dense<0.000000e+00> : vector<16x32xf32>
    %6 = tpu.matmul %2, %5, %cst {dimension_numbers = #tpu.dot_dimension_numbers<[1], [0], [0], [1], [0, 0, 1, 1], [], []>} : vector<16x32xbf16>, vector<32x32xbf16>, vector<16x32xf32> -> vector<16x32xf32>
    %c0_5 = arith.constant 0 : index
    %c0_6 = arith.constant 0 : index
    %7 = vector.load %arg3[%c0_5, %c0_6] : memref<32x32xf32, #tpu.memory_space<vmem>>, vector<16x32xf32>
    tpu.vector_store %arg3[%c0_5, %c0_6], %6 {strides = array<i32>} : memref<32x32xf32, #tpu.memory_space<vmem>>, vector<16x32xf32>,
    %c1 = arith.constant 1 : index
    %c0_7 = arith.constant 0 : index
    %c0_8 = arith.constant 0 : index
    %8 = vector.load %arg0[%c1, %c0_7, %c0_8] : memref<2x16x32xf32, #tpu.memory_space<vmem>>, vector<1x16x32xf32>
    %9 = vector.shape_cast %8 : vector<1x16x32xf32> to vector<16x32xf32>
    %10 = arith.truncf %9 : vector<16x32xf32> to vector<16x32xbf16>
    %c1_9 = arith.constant 1 : index
    %c0_10 = arith.constant 0 : index
    %c0_11 = arith.constant 0 : index
    %11 = vector.load %arg1[%c1_9, %c0_10, %c0_11] : memref<2x32x32xf32, #tpu.memory_space<vmem>>, vector<1x32x32xf32>
    %12 = vector.shape_cast %11 : vector<1x32x32xf32> to vector<32x32xf32>
    %13 = arith.truncf %12 : vector<32x32xf32> to vector<32x32xbf16>
    %cst_12 = arith.constant dense<0.000000e+00> : vector<16x32xf32>
    %14 = tpu.matmul %10, %13, %cst_12 {dimension_numbers = #tpu.dot_dimension_numbers<[1], [0], [0], [1], [0, 0, 1, 1], [], []>} : vector<16x32xbf16>, vector<32x32xbf16>, vector<16x32xf32> -> vector<16x32xf32>
    %c16 = arith.constant 16 : index
    %c0_13 = arith.constant 0 : index
    %15 = vector.load %arg3[%c16, %c0_13] : memref<32x32xf32, #tpu.memory_space<vmem>>, vector<16x32xf32>
    tpu.vector_store %arg3[%c16, %c0_13], %14 {strides = array<i32>} : memref<32x32xf32, #tpu.memory_space<vmem>>, vector<16x32xf32>,
    %c0_14 = arith.constant 0 : index
    %c0_15 = arith.constant 0 : index
    %16 = vector.load %arg3[%c0_14, %c0_15] : memref<32x32xf32, #tpu.memory_space<vmem>>, vector<32x32xf32>
    %17 = arith.truncf %16 : vector<32x32xf32> to vector<32x32xbf16>
    %18 = arith.mulf %16, %16 : vector<32x32xf32>
    %cst_16 = arith.constant dense<0.000000e+00> : vector<32xf32>
    %19 = vector.multi_reduction <add>, %18, %cst_16 [1] : vector<32x32xf32> to vector<32xf32>
    %20 = vector.shape_cast %19 : vector<32xf32> to vector<32x1xf32>
    %cst_17 = arith.constant 1.000000e+00 : f32
    %21 = vector.broadcast %cst_17 : f32 to vector<1x32xf32>
    %22 = tpu.iota {dimensions = array<i32: 1>} : vector<32x4xi32>
    %cst_18 = arith.constant 1.000000e+00 : f32
    %23 = vector.broadcast %cst_18 : f32 to vector<32x1xf32>
    %24 = tpu.concatenate %16, %23 in 1 : vector<32x32xf32>, vector<32x1xf32> -> vector<32x33xf32>
    %25 = arith.truncf %24 : vector<32x33xf32> to vector<32x33xbf16>
    %26 = vector.extract_strided_slice %16 {offsets = [0, 0], sizes = [4, 32], strides = [1, 1]} : vector<32x32xf32> to vector<4x32xf32>
    %c0_i32 = arith.constant 0 : i32
    %c20_i32 = arith.constant 20 : i32
    %27 = arith.addi %c0_i32, %c20_i32 : i32
    %c1_i32 = arith.constant 1 : i32
    %28 = scf.for %arg4 = %c0_i32 to %27 step %c1_i32 iter_args(%arg5 = %26) -> (vector<4x32xf32>)  : i32 {
      %48 = arith.truncf %arg5 : vector<4x32xf32> to vector<4x32xbf16>
      %cst_26 = arith.constant dense<0.000000e+00> : vector<32x4xf32>
      %49 = tpu.matmul %17, %48, %cst_26 {dimension_numbers = #tpu.dot_dimension_numbers<[1], [1], [0], [0], [0, 0, 1, 0], [], []>} : vector<32x32xbf16>, vector<4x32xbf16>, vector<32x4xf32> -> vector<32x4xf32>
      %50 = arith.mulf %arg5, %arg5 : vector<4x32xf32>
      %cst_27 = arith.constant dense<0.000000e+00> : vector<1x4xf32>
      %51 = tpu.matmul %21, %50, %cst_27 {dimension_numbers = #tpu.dot_dimension_numbers<[1], [1], [0], [0], [0, 0, 1, 0], [], []>} : vector<1x32xf32>, vector<4x32xf32>, vector<1x4xf32> -> vector<1x4xf32>
      %cst_28 = arith.constant 2.000000e+00 : f32
      %52 = vector.broadcast %cst_28 : f32 to vector<32x4xf32>
      %53 = arith.mulf %52, %49 : vector<32x4xf32>
      %54 = vector.broadcast %20 : vector<32x1xf32> to vector<32x4xf32>
      %55 = arith.subf %54, %53 : vector<32x4xf32>
      %56 = vector.broadcast %51 : vector<1x4xf32> to vector<32x4xf32>
      %57 = arith.addf %55, %56 : vector<32x4xf32>
      %cst_29 = arith.constant dense<0x7F800000> : vector<32xf32>
      %58 = vector.multi_reduction <minimumf>, %57, %cst_29 [1] : vector<32x4xf32> to vector<32xf32>
      %59 = vector.shape_cast %58 : vector<32xf32> to vector<32x1xf32>
      %60 = vector.broadcast %59 : vector<32x1xf32> to vector<32x4xf32>
      %61 = arith.cmpf ole, %57, %60 : vector<32x4xf32>
      %c4_i32_30 = arith.constant 4 : i32
      %62 = vector.broadcast %c4_i32_30 : i32 to vector<32x4xi32>
      %63 = arith.select %61, %22, %62 : vector<32x4xi1>, vector<32x4xi32>
      %cst_31 = arith.constant dense<2147483647> : vector<32xi32>
      %64 = vector.multi_reduction <minsi>, %63, %cst_31 [1] : vector<32x4xi32> to vector<32xi32>
      %65 = vector.shape_cast %64 : vector<32xi32> to vector<32x1xi32>
      %66 = vector.broadcast %65 : vector<32x1xi32> to vector<32x4xi32>
      %67 = arith.cmpi eq, %22, %66 : vector<32x4xi32>
      %68 = arith.extui %67 : vector<32x4xi1> to vector<32x4xi32>
      %69 = arith.sitofp %68 : vector<32x4xi32> to vector<32x4xf32>
      %70 = arith.truncf %69 : vector<32x4xf32> to vector<32x4xbf16>
      %cst_32 = arith.constant dense<0.000000e+00> : vector<4x33xf32>
      %71 = tpu.matmul %70, %25, %cst_32 {dimension_numbers = #tpu.dot_dimension_numbers<[0], [0], [1], [1], [0, 1, 1, 1], [], []>} : vector<32x4xbf16>, vector<32x33xbf16>, vector<4x33xf32> -> vector<4x33xf32>
      %72 = vector.extract_strided_slice %71 {offsets = [0, 32], sizes = [4, 1], strides = [1, 1]} : vector<4x33xf32> to vector<4x1xf32>
      %73 = vector.extract_strided_slice %71 {offsets = [0, 0], sizes = [4, 32], strides = [1, 1]} : vector<4x33xf32> to vector<4x32xf32>
      %cst_33 = arith.constant 1.000000e+00 : f32
      %74 = vector.broadcast %cst_33 : f32 to vector<4x1xf32>
      %75 = arith.maximumf %72, %74 : vector<4x1xf32>
      %76 = vector.broadcast %75 : vector<4x1xf32> to vector<4x32xf32>
      %77 = arith.divf %73, %76 : vector<4x32xf32>
      %cst_34 = arith.constant 0.000000e+00 : f32
      %78 = vector.broadcast %cst_34 : f32 to vector<4x1xf32>
      %79 = arith.cmpf ogt, %72, %78 : vector<4x1xf32>
      %80 = vector.shape_cast %79 : vector<4x1xi1> to vector<4x1xi1>
      %81 = vector.broadcast %80 : vector<4x1xi1> to vector<4x32xi1>
      %82 = arith.select %81, %77, %arg5 : vector<4x32xi1>, vector<4x32xf32>
      scf.yield %82 : vector<4x32xf32>
    }
    %29 = arith.truncf %28 : vector<4x32xf32> to vector<4x32xbf16>
    %cst_19 = arith.constant dense<0.000000e+00> : vector<32x4xf32>
    %30 = tpu.matmul %17, %29, %cst_19 {dimension_numbers = #tpu.dot_dimension_numbers<[1], [1], [0], [0], [0, 0, 1, 0], [], []>} : vector<32x32xbf16>, vector<4x32xbf16>, vector<32x4xf32> -> vector<32x4xf32>
    %31 = arith.mulf %28, %28 : vector<4x32xf32>
    %cst_20 = arith.constant dense<0.000000e+00> : vector<1x4xf32>
    %32 = tpu.matmul %21, %31, %cst_20 {dimension_numbers = #tpu.dot_dimension_numbers<[1], [1], [0], [0], [0, 0, 1, 0], [], []>} : vector<1x32xf32>, vector<4x32xf32>, vector<1x4xf32> -> vector<1x4xf32>
    %cst_21 = arith.constant 2.000000e+00 : f32
    %33 = vector.broadcast %cst_21 : f32 to vector<32x4xf32>
    %34 = arith.mulf %33, %30 : vector<32x4xf32>
    %35 = vector.broadcast %20 : vector<32x1xf32> to vector<32x4xf32>
    %36 = arith.subf %35, %34 : vector<32x4xf32>
    %37 = vector.broadcast %32 : vector<1x4xf32> to vector<32x4xf32>
    %38 = arith.addf %36, %37 : vector<32x4xf32>
    %cst_22 = arith.constant dense<0x7F800000> : vector<32xf32>
    %39 = vector.multi_reduction <minimumf>, %38, %cst_22 [1] : vector<32x4xf32> to vector<32xf32>
    %40 = vector.shape_cast %39 : vector<32xf32> to vector<32x1xf32>
    %41 = vector.broadcast %40 : vector<32x1xf32> to vector<32x4xf32>
    %42 = arith.cmpf ole, %38, %41 : vector<32x4xf32>
    %c4_i32 = arith.constant 4 : i32
    %43 = vector.broadcast %c4_i32 : i32 to vector<32x4xi32>
    %44 = arith.select %42, %22, %43 : vector<32x4xi1>, vector<32x4xi32>
    %cst_23 = arith.constant dense<2147483647> : vector<32xi32>
    %45 = vector.multi_reduction <minsi>, %44, %cst_23 [1] : vector<32x4xi32> to vector<32xi32>
    %46 = vector.shape_cast %45 : vector<32xi32> to vector<32x1xi32>
    %c0_24 = arith.constant 0 : index
    %c0_25 = arith.constant 0 : index
    %47 = vector.load %arg2[%c0_24, %c0_25] : memref<32x1xi32, #tpu.memory_space<vmem>>, vector<32x1xi32>
    tpu.vector_store %arg2[%c0_24, %c0_25], %46 {strides = array<i32>} : memref<32x1xi32, #tpu.memory_space<vmem>>, vector<32x1xi32>,
    return
  }
}

</mosaic_0001>

<bundles_post_ra>
// kernel: tpu_custom_call.1
= control target key start
LH: loop header
LB: loop body
LE: loop exit
PB: predicated region body
PF: predicated region fallthrough
CT: control target
= control target key end

     0   :  { %7 = vsyncpa [#allocation4], 0  ;;  %s1156_s0 = inlined_call_operand.hbm [shape: f32[2,16,32], index: 0, kind: input, shape index: {}]   ;;  %s1157_s1 = inlined_call_operand.hbm [shape: f32[2,32,32], index: 1, kind: input, shape index: {}]   ;;  %s1158_s2 = inlined_call_operand.vmem [shape: s32[32,1], index: 2, kind: output, shape index: {}]  }
   0x1   :  { %8 = vsyncpa [#allocation6], 0  ;;  %s941_s9 = smov [#allocation3]   ;;  %s877_s13 = scalar_lea.hbm %s1156_s0, 512 }
   0x2   :  { %s14_s10 = sshll.u32 %s941_s9, 4  ;;  %p878_p0 = scmp.ne.s32.totalorder %s1156_s0, %s877_s13  ;;  %s15_s10 = int_to_ptr.vmem [resolvable:$true] %s14_s10 }
   0x3   :  { %p881_p1 = scmp.lt.u32.totalorder %s877_s13, %s1156_s0 }
   0x5   :  { %p883_p2 = pnand %p881_p1, %p878_p0 }
   0x7   :  { %886 = shalt.err (!%p883_p2)
}
   0x8   :  { %s887_s18 = scalar_lea.vmem %s15_s10, 512  ;;  %p892_p4 = scmp.lt.s32.totalorder %s15_s10, %s15_s10 }
   0x9   :  { %p888_p3 = scmp.ne.s32.totalorder %s15_s10, %s887_s18  ;;  %p893_p5 = scmp.lt.s32.totalorder %s887_s18, %s887_s18 }
   0xb   :  { %p894_p6 = por %p893_p5, %p892_p4 }
   0xd   :  { %p895_p7 = pnand %p894_p6, %p888_p3 }
   0xf   :  { %898 = shalt.err (!%p895_p7)
}
  0x10   :  { %s942_s19 = smov 128   ;;  %s943_s20 = smov 8  }
  0x11   :  { %20 = dma.hbm_to_vmem [thread:$0]  %s1156_s0, 512, %s15_s10, [#allocation4], %s942_s19, %s942_s19, %s943_s20  }
  0x12   :  { %s944_s23 = smov [#allocation5]   ;;  %s899_s27 = scalar_lea.hbm %s1157_s1, 1024 }
  0x13   :  { %s26_s24 = sshll.u32 %s944_s23, 4  ;;  %p900_p8 = scmp.ne.s32.totalorder %s1157_s1, %s899_s27  ;;  %s27_s24 = int_to_ptr.vmem [resolvable:$true] %s26_s24 }
  0x14   :  { %p903_p9 = scmp.lt.u32.totalorder %s899_s27, %s1157_s1 }
  0x16   :  { %p905_p10 = pnand %p903_p9, %p900_p8 }
  0x18   :  { %908 = shalt.err (!%p905_p10)
}
  0x19   :  { %s909_s4 = scalar_lea.vmem %s27_s24, 1024  ;;  %p914_p12 = scmp.lt.s32.totalorder %s27_s24, %s27_s24 }
  0x1a   :  { %p910_p11 = scmp.ne.s32.totalorder %s27_s24, %s909_s4  ;;  %p915_p13 = scmp.lt.s32.totalorder %s909_s4, %s909_s4 }
  0x1c   :  { %p916_p0 = por %p915_p13, %p914_p12 }
  0x1e   :  { %p917_p1 = pnand %p916_p0, %p910_p11 }
  0x20   :  { %920 = shalt.err (!%p917_p1)
}
  0x21   :  { %32 = dma.hbm_to_vmem [thread:$0]  %s1157_s1, 1024, %s27_s24, [#allocation6], %s942_s19, %s942_s19, %s943_s20  }
  0x22   :  { %929 = dma.done.wait [#allocation4], 512  }
  0x23   :  { %930 = vsyncadd [#allocation4], 4294966784 }
  0x24   :  { %931 = dma.done.wait [#allocation6], 1024  }
  0x25   :  { %932 = vsyncadd [#allocation6], 4294966272  ;;  %v945_v0 = vmov 0.0   ;;  %vm946_vm0 = vmmov 0   ;;  %v43_v1 = vld [vmem:[#allocation5] sm:$0xff]  ;;  %v44_v2 = vld [vmem:[#allocation5 + $0x8] sm:$0xff]  ;;  %v175_v47 = vlaneseq }
  0x26   :  { %797 = vmatprep.subr.bf16.mxu0 %v945_v0  ;;  %805 = vmatprep.subr.bf16.mxu1 %v945_v0  ;;  %v101_v3 = vld [vmem:[#allocation5 + $0x20] sm:$0xff]  ;;  %v47_v4 = vpack.c.bf16 %v44_v2, %v43_v1  ;;  %v102_v5 = vld [vmem:[#allocation5 + $0x28] sm:$0xff]  ;;  %v45_v6 = vld [vmem:[#allocation5 + $0x10] sm:$0xff]  ;;  %vm49_vm1 = vcmask 261120   ;;  %s1043_s1 = smov 0  }
  0x27   :  { %801 = vmatprep.mubr.msk.bf16.mxu0 %vm946_vm0, %v945_v0  ;;  %809 = vmatprep.mubr.msk.bf16.mxu1 %vm946_vm0, %v945_v0  ;;  %v46_v7 = vld [vmem:[#allocation5 + $0x18] sm:$0xff]  ;;  %v105_v8 = vpack.c.bf16 %v102_v5, %v101_v3  ;;  %v103_v9 = vld [vmem:[#allocation5 + $0x30] sm:$0xff]  ;;  %v40_v12 = vld [vmem:[#allocation3] sm:$0xff]  ;;  %v1031_v48 = vand.u32 127, %v175_v47 }
  0x28   :  { %v104_v10 = vld [vmem:[#allocation5 + $0x38] sm:$0xff]  ;;  %798 = vmatpush3.bf16.msra.mxu0 %v47_v4  ;;  %v48_v11 = vpack.c.bf16 %v46_v7, %v45_v6  ;;  %v41_v13 = vld [vmem:[#allocation3 + $0x8] sm:$0xff]  ;;  %v97_v15 = vld [vmem:[#allocation3 + $0x10] sm:$0xff] }
  0x29   :  { %806 = vmatpush3.bf16.msra.mxu1 %v105_v8  ;;  %799 = vmatprep.subr.bf16.mxu0 %v945_v0  ;;  %v106_v14 = vpack.c.bf16 %v104_v10, %v103_v9  ;;  %v98_v16 = vld [vmem:[#allocation3 + $0x18] sm:$0xff]  ;;  %v42_v17 = vpack.c.bf16 %v41_v13, %v40_v12 }
  0x2a   :  { %807 = vmatprep.subr.bf16.mxu1 %v945_v0  ;;  %v99_v18 = vpack.c.bf16 %v98_v16, %v97_v15 }
  0x2c   :  { %800 = vmatpush3.bf16.msra.mxu0 %v48_v11 }
  0x2d   :  { %808 = vmatpush3.bf16.msra.mxu1 %v106_v14 }
  0x2f   :  { %802 = vmatmul.mubr.msk.bf16.vlgmr.msra.gmra.mrb[0].mxu0 %vm49_vm1, %v42_v17 }
  0x30   :  { %810 = vmatmul.mubr.msk.bf16.vlgmr.msra.gmra.mrb[0].mxu1 %vm49_vm1, %v99_v18 }
 0x102   :  { %v87_v19 = vpop.f32.mrb[0].mxu0 }
 0x103   :  { %94 = vst.msk [vmem:[#allocation2] sm:$0xff] %vm49_vm1, %v87_v19  ;;  %v144_v20 = vpop.f32.mrb[0].mxu1  ;;  %v803_v21 = vpop.f32.mrb[1].mxu0 }
 0x104   :  { %151 = vst.msk [vmem:[#allocation2 + $0x10] sm:$0xff] %vm49_vm1, %v144_v20  ;;  %v811_v22 = vpop.f32.mrb[1].mxu1  ;;  %v90_v23 = vpop.f32.mrb[2].mxu0 }
 0x105   :  { %95 = vst.msk [vmem:[#allocation2 + $0x8] sm:$0xff] %vm49_vm1, %v90_v23  ;;  %v147_v24 = vpop.f32.mrb[2].mxu1  ;;  %v804_v25 = vpop.f32.mrb[3].mxu0 }
 0x106   :  { %152 = vst.msk [vmem:[#allocation2 + $0x18] sm:$0xff] %vm49_vm1, %v147_v24  ;;  %v812_v26 = vpop.f32.mrb[3].mxu1 }
 0x10a   :  { %v153_v27 = vld [vmem:[#allocation2] sm:$0xff]  }
 0x10b   :  { %v155_v28 = vld [vmem:[#allocation2 + $0x10] sm:$0xff]  ;;  %v159_v29 = vmul.f32 %v153_v27, %v153_v27  ;;  %v1010_v32 = vsel %vm49_vm1, %v153_v27, 1.0 }
 0x10c   :  { %v161_v30 = vmul.f32 %v155_v28, %v155_v28  ;;  %v1007_v31 = vsel %vm49_vm1, %v155_v28, 1.0  ;;  %v154_v33 = vld [vmem:[#allocation2 + $0x8] sm:$0xff] }
 0x10d   :  { %v163_v34 = vsel %vm49_vm1, %v159_v29, 0.0  ;;  %v156_v35 = vld [vmem:[#allocation2 + $0x18] sm:$0xff]  ;;  %v160_v36 = vmul.f32 %v154_v33, %v154_v33  ;;  %v1014_v37 = vsel %vm49_vm1, %v154_v33, 1.0  ;;  %v1016_v38 = vpack.c.bf16 %v154_v33, %v153_v27 }
 0x10e   :  { %v169_v39 = vsel %vm49_vm1, %v161_v30, 0.0  ;;  %164 = vadd.xlane.f32.xlu0 %v163_v34  ;;  %v162_v40 = vmul.f32 %v156_v35, %v156_v35  ;;  %v1020_v41 = vsel %vm49_vm1, %v156_v35, 1.0  ;;  %v1022_v42 = vpack.c.bf16 %v156_v35, %v155_v28 }
 0x10f   :  { %170 = vadd.xlane.f32.xlu1 %v169_v39  ;;  %v182_v43 = vpack.c.bf16 %v1020_v41, %v1007_v31  ;;  %v181_v44 = vpack.c.bf16 %v1014_v37, %v1010_v32  ;;  %v166_v45 = vsel %vm49_vm1, %v160_v36, 0.0 }
 0x110   :  { %v172_v46 = vsel %vm49_vm1, %v162_v40, 0.0 }
 0x112   :  { %167 = vadd.xlane.f32.xlu0 %v166_v45 }
 0x113   :  { %173 = vadd.xlane.f32.xlu1 %v172_v46 }
 0x19b   :  { %v1033_v49 = vpop.xlane.xlu0 %164 }
 0x19c   :  { %v1035_v50 = vpop.xlane.xlu1 %170 }
 0x19f   :  { %v1037_v51 = vpop.xlane.xlu0 %167 }
 0x1a0   :  { %v1039_v52 = vpop.xlane.xlu1 %173 }
 0x1a1 LB: > { %815 = vmatprep.mubr.msk.bf16.mxu0 %vm49_vm1, %v1016_v38  ;;  %v947_v53 = vmov 0.0   ;;  %vm948_vm2 = vmmov 0   ;;  %v190_v54 = vpack.c.bf16 %v935_v27, %v935_v27  ;;  %v249_v55 = vmul.f32 %v935_v27, %v935_v27  ;;  %s188_s1 = sadd.s32 1, %s939_s1   ;;  %s939_s1 = sphi %s1043_s1, %s188_s1   ;;  %v935_v27 = vphi %v153_v27, %v1159_v27  }
 0x1a2   : > { %819 = vmatprep.subr.mxu1 %v947_v53  ;;  %821 = vmatprep.mubr.msk.f32.mxu1 %vm948_vm2, %v947_v53  ;;  %v949_v57 = vmov 1.0   ;;  %v1075_v58 = vshrl.u32 %v175_v47, 7  ;;  %vm342_vm3 = vcmask 31744   ;;  %p185_p2 = scmp.ge.s32.totalorder %s188_s1, 20  }
 0x1a3   : > { %843 = vmatprep.subr.msk.bf16.mxu0 %vm49_vm1, %v190_v54  ;;  %v198_v56 = vsel %vm49_vm1, %v190_v54, 0  ;;  %820 = vmatpush3.xpose.msk.msra.mxu1 %vm49_vm1, %v249_v55 }
 0x1a4   : > { %814 = vmatpush3.bf16.xpose.msra.mxu0 %v198_v56  ;;  %824 = vmatprep.subr.bf16.mxu1 %v947_v53  ;;  %v336_v61 = vsub.s32 0, %v1075_v58 }
 0x1a6   : > { %822 = vmatmul.mubr.msk.f32.vlgmr.msra.gmra.mrb[0].mxu1 %vm49_vm1, %v949_v57 }
 0x1a7   : > { %825 = vmatpush3.bf16.msra.mxu1 %v181_v44  ;;  %828 = vmatprep.mubr.msk.bf16.mxu1 %vm948_vm2, %v947_v53 }
 0x1a8   : > { %826 = vmatprep.subr.bf16.mxu1 %v947_v53 }
 0x1ab   : > { %816 = vmatmul.mubr.msk.bf16.vlgmr.msra.gmra.mrb[0].mxu0 %vm49_vm1, %v1022_v42  ;;  %827 = vmatpush3.bf16.msra.mxu1 %v182_v43 }
 0x1ac   :  { %838 = vmatprep.subr.mxu1 (%p185_p2), %v945_v0  ;;  %834 = vmatprep.mubr.msk.bf16.mxu0 (%p185_p2), %vm49_vm1, %v1016_v38 }
 0x279   : > { %v322_v59 = vpop.f32.mrb[0].mxu1 }
 0x27a   : > { %v823_v60 = vpop.f32.mrb[1].mxu1  ;;  %v337_v2 = vrot.slane %v322_v59, %v336_v61 }
 0x27e   : > { %v817_v62 = vpop.f32.mrb[0].mxu0 }
 0x27f   : > { %v328_v63 = vmul.f32 2.0, %v817_v62  ;;  %v234_v1 = vpop.f32.mrb[1].mxu0 }
 0x280   : > { %v326_v3 = vmul.f32 2.0, %v234_v1  ;;  %v818_v4 = vpop.f32.mrb[2].mxu0 }
 0x281   : > { %v332_v5 = vsub.f32 %v1035_v50, %v328_v63  ;;  %v329_v6 = vmul.f32 2.0, %v818_v4  ;;  %v237_v7 = vpop.f32.mrb[3].mxu0 }
 0x282   : > { %v330_v8 = vsub.f32 %v1033_v49, %v326_v3  ;;  %v327_v9 = vmul.f32 2.0, %v237_v7 }
 0x283   : > { %v333_v10 = vsub.f32 %v1039_v52, %v329_v6  ;;  %v340_v11 = vadd.f32 %v337_v2, %v332_v5 }
 0x284   : > { %v331_v12 = vsub.f32 %v1037_v51, %v327_v9  ;;  %v338_v13 = vadd.f32 %v337_v2, %v330_v8 }
 0x285   : > { %v349_v14 = vsel %vm342_vm3, %v340_v11, inf  ;;  %v341_v15 = vadd.f32 %v337_v2, %v333_v10 }
 0x286   : > { %v339_v16 = vadd.f32 %v337_v2, %v331_v12  ;;  %350 = vmin.xlane.f32.xlu1 %v349_v14  ;;  %v343_v17 = vsel %vm342_vm3, %v338_v13, inf }
 0x287   : > { %344 = vmin.xlane.f32.xlu0 %v343_v17  ;;  %v352_v18 = vsel %vm342_vm3, %v341_v15, inf }
 0x288   : > { %v346_v19 = vsel %vm342_vm3, %v339_v16, inf }
 0x28a   : > { %353 = vmin.xlane.f32.xlu1 %v352_v18 }
 0x28b   : > { %347 = vmin.xlane.f32.xlu0 %v346_v19 }
 0x313   : > { %v351_v20 = vpop.xlane.xlu1 %350 }
 0x314   : > { %vm357_vm4 = vcmp.le.f32.partialorder %v340_v11, %v351_v20  ;;  %v345_v21 = vpop.xlane.xlu0 %344 }
 0x315   : > { %v361_v22 = vsel %vm357_vm4, %v1031_v48, 4  ;;  %vm355_vm5 = vcmp.le.f32.partialorder %v338_v13, %v345_v21 }
 0x316   : > { %v359_v23 = vsel %vm355_vm5, %v1031_v48, 4  ;;  %v393_v24 = vsel %vm342_vm3, %v361_v22, 2147483647 }
 0x317   : > { %v363_v25 = vsel %vm342_vm3, %v359_v23, 2147483647  ;;  %v354_v26 = vpop.xlane.xlu1 %353  ;;  %v395_v35 = vshra.s32 %v393_v24, 16  ;;  %v394_v57 = vand.u32 65535, %v393_v24 }
 0x318   : > { %vm358_vm6 = vcmp.le.f32.partialorder %v341_v15, %v354_v26  ;;  %v348_v28 = vpop.xlane.xlu0 %347  ;;  %v365_v29 = vshra.s32 %v363_v25, 16  ;;  %v364_v56 = vand.u32 65535, %v363_v25 }
 0x319   : > { %v362_v30 = vsel %vm358_vm6, %v1031_v48, 4  ;;  %vm356_vm7 = vcmp.le.f32.partialorder %v339_v16, %v348_v28  ;;  %v397_v45 = vcvt.s32.f32 %v395_v35  ;;  %v396_v5 = vcvt.s32.f32 %v394_v57 }
 0x31a   : > { %v360_v33 = vsel %vm356_vm7, %v1031_v48, 4  ;;  %v367_v34 = vcvt.s32.f32 %v365_v29  ;;  %v408_v36 = vsel %vm342_vm3, %v362_v30, 2147483647  ;;  %v366_v62 = vcvt.s32.f32 %v364_v56 }
 0x31b   : > { %v378_v39 = vsel %vm342_vm3, %v360_v33, 2147483647  ;;  %v410_v54 = vshra.s32 %v408_v36, 16  ;;  %v409_v1 = vand.u32 65535, %v408_v36 }
 0x31c   : > { %368 = vmin.xlane.f32.xlu0 %v367_v34  ;;  %v380_v40 = vshra.s32 %v378_v39, 16  ;;  %v379_v59 = vand.u32 65535, %v378_v39 }
 0x31d   : > { %v412_v55 = vcvt.s32.f32 %v410_v54  ;;  %v411_v9 = vcvt.s32.f32 %v409_v1  ;;  %v950_v54 = vmov 32  }
 0x31e   : > { %v382_v46 = vcvt.s32.f32 %v380_v40  ;;  %v381_v4 = vcvt.s32.f32 %v379_v59  ;;  %873 = vset.pattern.permute.xlu1 %v950_v54 }
 0x320   : > { %398 = vmin.xlane.f32.xlu0 %v397_v45  ;;  %383 = vmin.xlane.f32.xlu1 %v382_v46 }
 0x324   : > { %413 = vmin.xlane.f32.xlu1 %v412_v55 }
 0x3a9   : > { %v369_v60 = vpop.xlane.xlu0 %368 }
 0x3aa   : > { %vm370_vm8 = vcmp.eq.f32.partialorder %v367_v34, %v369_v60  ;;  %v375_v11 = vcvt.f32.s32 %v369_v60 }
 0x3ab   : > { %v371_v63 = vsel %vm370_vm8, %v366_v62, inf  ;;  %v951_v62 = vmov 0  }
 0x3ac   : > { %372 = vmin.xlane.f32.xlu0 %v371_v63  ;;  %v376_v14 = vshll.u32 %v375_v11, 16 }
 0x3ad   : > { %v384_v2 = vpop.xlane.xlu1 %383  ;;  %v399_v3 = vpop.xlane.xlu0 %398 }
 0x3ae   : > { %vm385_vm9 = vcmp.eq.f32.partialorder %v382_v46, %v384_v2  ;;  %vm400_vm10 = vcmp.eq.f32.partialorder %v397_v45, %v399_v3  ;;  %v390_v12 = vcvt.f32.s32 %v384_v2  ;;  %v405_v15 = vcvt.f32.s32 %v399_v3 }
 0x3af   : > { %v386_v6 = vsel %vm385_vm9, %v381_v4, inf  ;;  %v401_v7 = vsel %vm400_vm10, %v396_v5, inf  ;;  %vm744_vm10 = vcmask (%p185_p2), 7168  }
 0x3b0   : > { %387 = vmin.xlane.f32.xlu1 %v386_v6  ;;  %402 = vmin.xlane.f32.xlu0 %v401_v7  ;;  %v391_v18 = vshll.u32 %v390_v12, 16  ;;  %v406_v21 = vshll.u32 %v405_v15, 16  ;;  %v952_v7 = vmov (%p185_p2), 1.0  }
 0x3b1   : > { %v414_v8 = vpop.xlane.xlu1 %413 }
 0x3b2   : > { %vm415_vm11 = vcmp.eq.f32.partialorder %v412_v55, %v414_v8  ;;  %v420_v22 = vcvt.f32.s32 %v414_v8 }
 0x3b3   : > { %v416_v10 = vsel %vm415_vm11, %v411_v9, inf }
 0x3b4   : > { %417 = vmin.xlane.f32.xlu1 %v416_v10  ;;  %v421_v29 = vshll.u32 %v420_v22, 16 }
 0x439   : > { %v373_v13 = vpop.xlane.xlu0 %372 }
 0x43a   : > { %v374_v16 = vcvt.f32.s32 %v373_v13 }
 0x43c   : > { %v377_v17 = vadd.s32 %v376_v14, %v374_v16 }
 0x43d   : > { %v388_v19 = vpop.xlane.xlu1 %387  ;;  %v403_v20 = vpop.xlane.xlu0 %402 }
 0x43e   : > { %v389_v23 = vcvt.f32.s32 %v388_v19  ;;  %v404_v24 = vcvt.f32.s32 %v403_v20  ;;  %vm423_vm12 = vcmp.eq.s32.totalorder %v1031_v48, %v377_v17 }
 0x43f   : > { %v769_v33 = vsel %vm423_vm12, 1.0, %v947_v53 }
 0x440   : > { %v392_v25 = vadd.s32 %v391_v18, %v389_v23  ;;  %v407_v26 = vadd.s32 %v406_v21, %v404_v24 }
 0x441   : > { %v418_v28 = vpop.xlane.xlu1 %417 }
 0x442   : > { %vm424_vm13 = vcmp.eq.s32.totalorder %v1031_v48, %v392_v25  ;;  %v419_v30 = vcvt.f32.s32 %v418_v28  ;;  %vm425_vm14 = vcmp.eq.s32.totalorder %v1031_v48, %v407_v26 }
 0x443   : > { %v770_v34 = vsel %vm424_vm13, 1.0, %v947_v53  ;;  %v771_v39 = vsel %vm425_vm14, 1.0, %v947_v53 }
 0x444   : > { %v422_v35 = vadd.s32 %v421_v29, %v419_v30  ;;  %v435_v36 = vpack.c.bf16 %v770_v34, %v769_v33 }
 0x446   : > { %vm426_vm15 = vcmp.eq.s32.totalorder %v1031_v48, %v422_v35  ;;  %437 = vxpose.xlu0.c.b16.start [1/2] (short) (narrow) %v435_v36, 16 }
 0x447   : > { %v772_v40 = vsel %vm426_vm15, 1.0, %v947_v53 }
 0x448   : > { %v436_v45 = vpack.c.bf16 %v772_v40, %v771_v39 }
 0x44a   : > { %438 = vxpose.xlu0.c.b16.end [2/2] (short) (narrow) %v436_v45, 16 }
 0x453   : > { %874 = vset.pattern.permute.xlu0 %v950_v54 }
 0x4ac   : > { %v445_v46 = vpop.trf.xlu0 }
 0x4ad   : > { %829 = vmatmul.mubr.msk.bf16.vlgmr.msra.gmra.mrb[4].mxu1 %vm49_vm1, %v445_v46 }
 0x4ae   :  { %840 = vmatprep.mubr.msk.f32.mxu1 (%p185_p2), %vm946_vm0, %v945_v0 }
 0x580   : > { %v490_v55 = vpop.f32.mrb[4].mxu1 }
 0x581   : > { %v496_v56 = vmax.f32 %v490_v55, 1.0  ;;  %v830_v57 = vpop.f32.mrb[5].mxu1  ;;  %vm504_vm2 = vcmp.gt.f32.partialorder %v490_v55, 0.0 }
 0x582   : > { %v493_v59 = vpop.f32.mrb[6].mxu1  ;;  %v505_v63 = vsel %vm504_vm2, 1, %v951_v62 }
 0x583   : > { %499 = vperm.xlu1 %873, %v496_v56   ;;  %v831_v60 = vpop.f32.mrb[7].mxu1 }
 0x587   : > { %507 = vperm.xlu1 %873, %v505_v63  }
 0x602   : > { %v500_v1 = vpop.permute.xlu1 %499 }
 0x603   : > { %875 = vrcp.f32 %v500_v1 }
 0x606   : > { %v508_v53 = vpop.permute.xlu1 %507 }
 0x607   : > { %vm509_vm4 = vcmp.eq.s32.totalorder %v508_v53, 1 }
 0x60b   :  { %187 = sbr.rel (!%p185_p2) target bundleno = 417 (0x1a1), region = 45 }
 0x60d   : > { %v876_v2 = vpop.eup %875 }
 0x60e   : > { %v503_v3 = vmul.f32 %v876_v2, %v490_v55 }
 0x610   : > { %v510_v4 = vsel %vm509_vm4, %v503_v3, %v935_v27  }
 0x611   : > { %v1159_v27 = vmov %v510_v4  ;;  %v511_v5 = vpack.c.bf16 (%p185_p2), %v510_v4, %v510_v4  ;;  %v570_v6 = vmul.f32 (%p185_p2), %v510_v4, %v510_v4 }
 0x613   :  { %844 = vmatprep.subr.msk.bf16.mxu0 %vm49_vm1, %v511_v5  ;;  %v519_v27 = vsel %vm49_vm1, %v511_v5, 0  ;;  %839 = vmatpush3.xpose.msk.msra.mxu1 %vm49_vm1, %v570_v6 }
 0x614   :  { %833 = vmatpush3.bf16.xpose.msra.mxu0 %v519_v27 }
 0x616   :  { %841 = vmatmul.mubr.msk.f32.vlgmr.msra.gmra.mrb[0].mxu1 %vm49_vm1, %v952_v7 }
 0x61b   :  { %835 = vmatmul.mubr.msk.bf16.vlgmr.msra.gmra.mrb[0].mxu0 %vm49_vm1, %v1022_v42 }
 0x6e9   :  { %v643_v31 = vpop.f32.mrb[0].mxu1 }
 0x6ea   :  { %v842_v32 = vpop.f32.mrb[1].mxu1  ;;  %v658_v0 = vrot.slane %v643_v31, %v336_v61 }
 0x6ee   :  { %v836_v37 = vpop.f32.mrb[0].mxu0 }
 0x6ef   :  { %v649_v38 = vmul.f32 2.0, %v836_v37  ;;  %v555_v41 = vpop.f32.mrb[1].mxu0 }
 0x6f0   :  { %v647_v43 = vmul.f32 2.0, %v555_v41  ;;  %v837_v44 = vpop.f32.mrb[2].mxu0 }
 0x6f1   :  { %v653_v47 = vsub.f32 %v1035_v50, %v649_v38  ;;  %v650_v8 = vmul.f32 2.0, %v837_v44  ;;  %v558_v9 = vpop.f32.mrb[3].mxu0 }
 0x6f2   :  { %v651_v10 = vsub.f32 %v1033_v49, %v647_v43  ;;  %v648_v11 = vmul.f32 2.0, %v558_v9 }
 0x6f3   :  { %v654_v12 = vsub.f32 %v1039_v52, %v650_v8  ;;  %v661_v42 = vadd.f32 %v658_v0, %v653_v47 }
 0x6f4   :  { %v652_v13 = vsub.f32 %v1037_v51, %v648_v11  ;;  %v659_v14 = vadd.f32 %v658_v0, %v651_v10 }
 0x6f5   :  { %v670_v15 = vsel %vm342_vm3, %v661_v42, inf  ;;  %v662_v16 = vadd.f32 %v658_v0, %v654_v12 }
 0x6f6   :  { %v660_v58 = vadd.f32 %v658_v0, %v652_v13  ;;  %671 = vmin.xlane.f32.xlu1 %v670_v15  ;;  %v664_v61 = vsel %vm342_vm3, %v659_v14, inf }
 0x6f7   :  { %665 = vmin.xlane.f32.xlu0 %v664_v61  ;;  %v673_v50 = vsel %vm342_vm3, %v662_v16, inf }
 0x6f8   :  { %v667_v49 = vsel %vm342_vm3, %v660_v58, inf }
 0x6fa   :  { %674 = vmin.xlane.f32.xlu1 %v673_v50 }
 0x6fb   :  { %668 = vmin.xlane.f32.xlu0 %v667_v49 }
 0x783   :  { %v672_v17 = vpop.xlane.xlu1 %671 }
 0x784   :  { %vm678_vm0 = vcmp.le.f32.partialorder %v661_v42, %v672_v17  ;;  %v666_v52 = vpop.xlane.xlu0 %665 }
 0x785   :  { %v682_v51 = vsel %vm678_vm0, %v1031_v48, 4  ;;  %vm676_vm1 = vcmp.le.f32.partialorder %v659_v14, %v666_v52 }
 0x786   :  { %v680_v18 = vsel %vm676_vm1, %v1031_v48, 4  ;;  %v714_v19 = vsel %vm342_vm3, %v682_v51, 2147483647 }
 0x787   :  { %v684_v20 = vsel %vm342_vm3, %v680_v18, 2147483647  ;;  %v675_v21 = vpop.xlane.xlu1 %674  ;;  %v716_v28 = vshra.s32 %v714_v19, 16  ;;  %v715_v45 = vand.u32 65535, %v714_v19 }
 0x788   :  { %vm679_vm5 = vcmp.le.f32.partialorder %v662_v16, %v675_v21  ;;  %v669_v22 = vpop.xlane.xlu0 %668  ;;  %v686_v23 = vshra.s32 %v684_v20, 16  ;;  %v685_v40 = vand.u32 65535, %v684_v20 }
 0x789   :  { %v683_v24 = vsel %vm679_vm5, %v1031_v48, 4  ;;  %vm677_vm6 = vcmp.le.f32.partialorder %v660_v58, %v669_v22  ;;  %v718_v34 = vcvt.s32.f32 %v716_v28  ;;  %v717_v62 = vcvt.s32.f32 %v715_v45 }
 0x78a   :  { %v681_v25 = vsel %vm677_vm6, %v1031_v48, 4  ;;  %v688_v26 = vcvt.s32.f32 %v686_v23  ;;  %v729_v29 = vsel %vm342_vm3, %v683_v24, 2147483647  ;;  %v687_v48 = vcvt.s32.f32 %v685_v40 }
 0x78b   :  { %v699_v30 = vsel %vm342_vm3, %v681_v25, 2147483647  ;;  %v731_v36 = vshra.s32 %v729_v29, 16  ;;  %v730_v56 = vand.u32 65535, %v729_v29 }
 0x78c   :  { %689 = vmin.xlane.f32.xlu0 %v688_v26  ;;  %v701_v33 = vshra.s32 %v699_v30, 16  ;;  %v700_v46 = vand.u32 65535, %v699_v30 }
 0x78d   :  { %v733_v39 = vcvt.s32.f32 %v731_v36  ;;  %v732_v2 = vcvt.s32.f32 %v730_v56 }
 0x78e   :  { %v703_v35 = vcvt.s32.f32 %v701_v33  ;;  %v702_v60 = vcvt.s32.f32 %v700_v46 }
 0x790   :  { %719 = vmin.xlane.f32.xlu0 %v718_v34  ;;  %704 = vmin.xlane.f32.xlu1 %v703_v35 }
 0x794   :  { %734 = vmin.xlane.f32.xlu1 %v733_v39 }
 0x819   :  { %v690_v54 = vpop.xlane.xlu0 %689 }
 0x81a   :  { %vm691_vm7 = vcmp.eq.f32.partialorder %v688_v26, %v690_v54  ;;  %v696_v4 = vcvt.f32.s32 %v690_v54 }
 0x81b   :  { %v692_v55 = vsel %vm691_vm7, %v687_v48, inf }
 0x81c   :  { %693 = vmin.xlane.f32.xlu0 %v692_v55  ;;  %v697_v27 = vshll.u32 %v696_v4, 16 }
 0x81d   :  { %v705_v57 = vpop.xlane.xlu1 %704  ;;  %v720_v59 = vpop.xlane.xlu0 %719 }
 0x81e   :  { %vm706_vm3 = vcmp.eq.f32.partialorder %v703_v35, %v705_v57  ;;  %vm721_vm8 = vcmp.eq.f32.partialorder %v718_v34, %v720_v59  ;;  %v711_v5 = vcvt.f32.s32 %v705_v57  ;;  %v726_v7 = vcvt.f32.s32 %v720_v59 }
 0x81f   :  { %v707_v63 = vsel %vm706_vm3, %v702_v60, inf  ;;  %v722_v1 = vsel %vm721_vm8, %v717_v62, inf }
 0x820   :  { %708 = vmin.xlane.f32.xlu1 %v707_v63  ;;  %723 = vmin.xlane.f32.xlu0 %v722_v1  ;;  %v712_v37 = vshll.u32 %v711_v5, 16  ;;  %v727_v0 = vshll.u32 %v726_v7, 16 }
 0x821   :  { %v735_v53 = vpop.xlane.xlu1 %734 }
 0x822   :  { %vm736_vm9 = vcmp.eq.f32.partialorder %v733_v39, %v735_v53  ;;  %v741_v43 = vcvt.f32.s32 %v735_v53 }
 0x823   :  { %v737_v3 = vsel %vm736_vm9, %v732_v2, inf }
 0x824   :  { %738 = vmin.xlane.f32.xlu1 %v737_v3  ;;  %v742_v11 = vshll.u32 %v741_v43, 16 }
 0x8a9   :  { %v694_v6 = vpop.xlane.xlu0 %693 }
 0x8aa   :  { %v695_v31 = vcvt.f32.s32 %v694_v6 }
 0x8ac   :  { %v698_v32 = vadd.s32 %v697_v27, %v695_v31 }
 0x8ad   :  { %v709_v38 = vpop.xlane.xlu1 %708  ;;  %v724_v41 = vpop.xlane.xlu0 %723 }
 0x8ae   :  { %745 = vst.msk [vmem:[%s1158_s2] sm:$0xff] %vm744_vm10, %v698_v32  ;;  %v710_v44 = vcvt.f32.s32 %v709_v38  ;;  %v725_v47 = vcvt.f32.s32 %v724_v41 }
 0x8b0   :  { %v713_v8 = vadd.s32 %v712_v37, %v710_v44  ;;  %v728_v9 = vadd.s32 %v727_v0, %v725_v47 }
 0x8b1   :  { %v739_v10 = vpop.xlane.xlu1 %738 }
 0x8b2   :  { %746 = vst.msk [vmem:[%s1158_s2 + $0x8] sm:$0xff] %vm744_vm10, %v713_v8  ;;  %747 = vst.msk [vmem:[%s1158_s2 + $0x10] sm:$0xff] %vm744_vm10, %v728_v9  ;;  %v740_v12 = vcvt.f32.s32 %v739_v10 }
 0x8b4   :  { %v743_v42 = vadd.s32 %v742_v11, %v740_v12 }
 0x8b6   :  { %748 = vst.msk [vmem:[%s1158_s2 + $0x18] sm:$0xff] %vm744_vm10, %v743_v42 }
 0x8b7   :  { %753 = vsyncpa [#allocation4], 1 }
 0x8b8   :  { %754 = vsyncpa [#allocation6], 1 }

</bundles_post_ra>
